<compile_context>
chip_gen: v6e
topology: v6e:2x2x1
jax: 0.10.0
libtpu: 0.0.40
codegen_flags: <defaults>
</compile_context>

<pallas_src>
import functools

import jax
import jax.numpy as jnp
from jax.experimental import pallas as pl
from jax.experimental.pallas import tpu as pltpu

_NUM_JOINTS = 17   # hard-coded in the reference module


def _custom_loss_kernel(slab_ref, loss_ref, *, n_valid, batch_size):
    # slab_ref: (6, B, J) float32
    #   row 0: pred x   row 1: pred y
    #   row 2: gt   x   row 3: gt   y
    #   row 4: pred confidence   row 5: gt class label
    confp = slab_ref[4]                                     # (B, J)
    conft = slab_ref[5]                                     # (B, J)

    # --- BCELoss terms (mean reduction); PyTorch clamps each log at -100. ---
    log_p = jnp.maximum(jnp.log(confp), -100.0)
    log_1mp = jnp.maximum(jnp.log(1.0 - confp), -100.0)
    bce = -(conft * log_p + (1.0 - conft) * log_1mp)        # (B, J)

    # --- masked squared error; mask is on the *predicted* confidence. ---
    keep = confp >= 0.5
    dx = jnp.where(keep, slab_ref[0] - slab_ref[2], 0.0)
    dy = jnp.where(keep, slab_ref[1] - slab_ref[3], 0.0)
    sq = dx * dx + dy * dy                                  # (B, J)

    # --- one lane reduce per quantity, one VPU combine, one final reduce. ---
    bce_row = jnp.sum(bce, axis=1, keepdims=True)           # (B, 1)
    sse_row = jnp.sum(sq, axis=1, keepdims=True)            # (B, 1)
    nj = 1.0 + jnp.sum((conft == 1.0).astype(jnp.float32),
                       axis=1, keepdims=True)               # (B, 1)

    total_row = (bce_row * (1.0 / n_valid)
                 + (0.5 / batch_size) * sse_row / nj)       # (B, 1)
    loss_ref[0, 0] = jnp.sum(total_row)


def _pack(output, target):
    """(B, J, 3) pred/target -> single (6, B, J) f32 slab (one DMA)."""
    out = output.astype(jnp.float32)
    tgt = target.astype(jnp.float32)
    return jnp.stack(
        [out[:, :, 0], out[:, :, 1],      # pred x, y
         tgt[:, :, 0], tgt[:, :, 1],      # gt   x, y
         out[:, :, 2], tgt[:, :, 2]],     # pred conf, gt class
        axis=0)


@jax.jit
def custom_loss(output, target):
    """output, target: (B, 17, 3) arrays (channels-last). Returns scalar f32 loss."""
    B, J, _ = output.shape
    slab = _pack(output, target)

    kernel = functools.partial(
        _custom_loss_kernel, n_valid=float(B * J), batch_size=float(B))

    cost = pl.CostEstimate(
        flops=20 * 6 * B * J,            # small elementwise + reduces
        transcendentals=2 * B * J,        # two logs per confidence element
        bytes_accessed=6 * B * J * 4 + 4,
    )

    res = pl.pallas_call(
        kernel,
        out_shape=jax.ShapeDtypeStruct((1, 1), jnp.float32),
        in_specs=[pl.BlockSpec(memory_space=pltpu.MemorySpace.VMEM)],
        out_specs=pl.BlockSpec(memory_space=pltpu.MemorySpace.SMEM),
        cost_estimate=cost,
    )(slab)
    return res[0, 0]


def _reference_loss(output, target):
    """Pure-JAX reference mirroring the PyTorch module."""
    out = output.astype(jnp.float32)
    tgt = target.astype(jnp.float32)
    class_pred = out[:, :, 2]
    class_gt = tgt[:, :, 2]
    log_p = jnp.maximum(jnp.log(class_pred), -100.0)
    log_1mp = jnp.maximum(jnp.log(1.0 - class_pred), -100.0)
    loss_class = jnp.mean(-(class_gt * log_p + (1.0 - class_gt) * log_1mp))
    keep = (class_pred >= 0.5)[..., None]
    diff = jnp.where(keep, out[:, :, :2] - tgt[:, :, :2], 0.0)
    per_batch = jnp.sum(diff * diff, axis=(1, 2))
    num_joints = 1.0 + jnp.sum((class_gt == 1.0).astype(jnp.float32), axis=1)
    loss_reg = jnp.sum(0.5 * per_batch / num_joints)
    return loss_class + loss_reg / out.shape[0]


if __name__ == "__main__":
    B, J = 2, _NUM_JOINTS

    key = jax.random.PRNGKey(0)
    k1, k2, k3, k4 = jax.random.split(key, 4)

    # predictions: free regression values, confidence in (0, 1) (BCE requires it)
    reg_pred = jax.random.normal(k1, (B, J, 2), dtype=jnp.float32)
    class_pred = jax.nn.sigmoid(jax.random.normal(k2, (B, J), dtype=jnp.float32))
    output = jnp.concatenate([reg_pred, class_pred[..., None]], axis=-1)

    # targets: free regression values, binary class labels
    reg_gt = jax.random.normal(k3, (B, J, 2), dtype=jnp.float32)
    class_gt = (jax.random.uniform(k4, (B, J)) > 0.5).astype(jnp.float32)
    target = jnp.concatenate([reg_gt, class_gt[..., None]], axis=-1)

    loss = custom_loss(output, target)
    jax.block_until_ready(loss)

    # sanity: finite scalar that matches the pure-JAX reference
    assert loss.shape == () and bool(jnp.isfinite(loss))
    ref = _reference_loss(output, target)
    assert bool(jnp.allclose(loss, ref, rtol=1e-4, atol=1e-5)), (loss, ref)
    print("KERNEL_OK")
</pallas_src>

<mosaic_0001>
module attributes {stable_mosaic.version = 11 : i64} {
  func.func @_custom_loss_kernel(%arg0: memref<6x2x17xf32, #tpu.memory_space<vmem>>, %arg1: memref<1x1xf32, #tpu.memory_space<smem>>) attributes {dimension_semantics = [], scalar_prefetch = 0 : i64, scratch_operands = 0 : i64, tpu.core_type = #tpu.core_type<tc>} {
    %c4 = arith.constant 4 : index
    %c0 = arith.constant 0 : index
    %c0_0 = arith.constant 0 : index
    %0 = vector.load %arg0[%c4, %c0, %c0_0] : memref<6x2x17xf32, #tpu.memory_space<vmem>>, vector<1x2x17xf32>
    %1 = vector.shape_cast %0 : vector<1x2x17xf32> to vector<2x17xf32>
    %c5 = arith.constant 5 : index
    %c0_1 = arith.constant 0 : index
    %c0_2 = arith.constant 0 : index
    %2 = vector.load %arg0[%c5, %c0_1, %c0_2] : memref<6x2x17xf32, #tpu.memory_space<vmem>>, vector<1x2x17xf32>
    %3 = vector.shape_cast %2 : vector<1x2x17xf32> to vector<2x17xf32>
    %4 = math.log %1 : vector<2x17xf32>
    %cst = arith.constant -1.000000e+02 : f32
    %5 = vector.broadcast %cst : f32 to vector<2x17xf32>
    %6 = arith.maximumf %4, %5 : vector<2x17xf32>
    %cst_3 = arith.constant 1.000000e+00 : f32
    %7 = vector.broadcast %cst_3 : f32 to vector<2x17xf32>
    %8 = arith.subf %7, %1 : vector<2x17xf32>
    %9 = math.log %8 : vector<2x17xf32>
    %cst_4 = arith.constant -1.000000e+02 : f32
    %10 = vector.broadcast %cst_4 : f32 to vector<2x17xf32>
    %11 = arith.maximumf %9, %10 : vector<2x17xf32>
    %12 = arith.mulf %3, %6 : vector<2x17xf32>
    %cst_5 = arith.constant 1.000000e+00 : f32
    %13 = vector.broadcast %cst_5 : f32 to vector<2x17xf32>
    %14 = arith.subf %13, %3 : vector<2x17xf32>
    %15 = arith.mulf %14, %11 : vector<2x17xf32>
    %16 = arith.addf %12, %15 : vector<2x17xf32>
    %cst_6 = arith.constant 0.000000e+00 : f32
    %17 = vector.broadcast %cst_6 : f32 to vector<2x17xf32>
    %18 = arith.subf %17, %16 : vector<2x17xf32>
    %cst_7 = arith.constant 5.000000e-01 : f32
    %19 = vector.broadcast %cst_7 : f32 to vector<2x17xf32>
    %20 = arith.cmpf oge, %1, %19 : vector<2x17xf32>
    %c0_8 = arith.constant 0 : index
    %c0_9 = arith.constant 0 : index
    %c0_10 = arith.constant 0 : index
    %21 = vector.load %arg0[%c0_8, %c0_9, %c0_10] : memref<6x2x17xf32, #tpu.memory_space<vmem>>, vector<1x2x17xf32>
    %22 = vector.shape_cast %21 : vector<1x2x17xf32> to vector<2x17xf32>
    %c2 = arith.constant 2 : index
    %c0_11 = arith.constant 0 : index
    %c0_12 = arith.constant 0 : index
    %23 = vector.load %arg0[%c2, %c0_11, %c0_12] : memref<6x2x17xf32, #tpu.memory_space<vmem>>, vector<1x2x17xf32>
    %24 = vector.shape_cast %23 : vector<1x2x17xf32> to vector<2x17xf32>
    %25 = arith.subf %22, %24 : vector<2x17xf32>
    %cst_13 = arith.constant 0.000000e+00 : f32
    %26 = vector.broadcast %cst_13 : f32 to vector<2x17xf32>
    %27 = arith.select %20, %25, %26 : vector<2x17xi1>, vector<2x17xf32>
    %c1 = arith.constant 1 : index
    %c0_14 = arith.constant 0 : index
    %c0_15 = arith.constant 0 : index
    %28 = vector.load %arg0[%c1, %c0_14, %c0_15] : memref<6x2x17xf32, #tpu.memory_space<vmem>>, vector<1x2x17xf32>
    %29 = vector.shape_cast %28 : vector<1x2x17xf32> to vector<2x17xf32>
    %c3 = arith.constant 3 : index
    %c0_16 = arith.constant 0 : index
    %c0_17 = arith.constant 0 : index
    %30 = vector.load %arg0[%c3, %c0_16, %c0_17] : memref<6x2x17xf32, #tpu.memory_space<vmem>>, vector<1x2x17xf32>
    %31 = vector.shape_cast %30 : vector<1x2x17xf32> to vector<2x17xf32>
    %32 = arith.subf %29, %31 : vector<2x17xf32>
    %cst_18 = arith.constant 0.000000e+00 : f32
    %33 = vector.broadcast %cst_18 : f32 to vector<2x17xf32>
    %34 = arith.select %20, %32, %33 : vector<2x17xi1>, vector<2x17xf32>
    %35 = arith.mulf %27, %27 : vector<2x17xf32>
    %36 = arith.mulf %34, %34 : vector<2x17xf32>
    %37 = arith.addf %35, %36 : vector<2x17xf32>
    %cst_19 = arith.constant dense<0.000000e+00> : vector<2xf32>
    %38 = vector.multi_reduction <add>, %18, %cst_19 [1] : vector<2x17xf32> to vector<2xf32>
    %39 = vector.shape_cast %38 : vector<2xf32> to vector<2x1xf32>
    %cst_20 = arith.constant dense<0.000000e+00> : vector<2xf32>
    %40 = vector.multi_reduction <add>, %37, %cst_20 [1] : vector<2x17xf32> to vector<2xf32>
    %41 = vector.shape_cast %40 : vector<2xf32> to vector<2x1xf32>
    %cst_21 = arith.constant 1.000000e+00 : f32
    %42 = vector.broadcast %cst_21 : f32 to vector<2x17xf32>
    %43 = arith.cmpf oeq, %3, %42 : vector<2x17xf32>
    %44 = arith.extui %43 : vector<2x17xi1> to vector<2x17xi32>
    %45 = arith.sitofp %44 : vector<2x17xi32> to vector<2x17xf32>
    %cst_22 = arith.constant dense<0.000000e+00> : vector<2xf32>
    %46 = vector.multi_reduction <add>, %45, %cst_22 [1] : vector<2x17xf32> to vector<2xf32>
    %47 = vector.shape_cast %46 : vector<2xf32> to vector<2x1xf32>
    %cst_23 = arith.constant 1.000000e+00 : f32
    %48 = vector.broadcast %cst_23 : f32 to vector<2x1xf32>
    %49 = arith.addf %48, %47 : vector<2x1xf32>
    %cst_24 = arith.constant 0.0294117648 : f32
    %50 = vector.broadcast %cst_24 : f32 to vector<2x1xf32>
    %51 = arith.mulf %39, %50 : vector<2x1xf32>
    %cst_25 = arith.constant 2.500000e-01 : f32
    %52 = vector.broadcast %cst_25 : f32 to vector<2x1xf32>
    %53 = arith.mulf %52, %41 : vector<2x1xf32>
    %54 = arith.divf %53, %49 : vector<2x1xf32>
    %55 = arith.addf %51, %54 : vector<2x1xf32>
    %56 = vector.shape_cast %55 : vector<2x1xf32> to vector<1x2x1xf32>
    %cst_26 = arith.constant dense<0.000000e+00> : vector<1xf32>
    %57 = vector.multi_reduction <add>, %56, %cst_26 [1, 2] : vector<1x2x1xf32> to vector<1xf32>
    %58 = vector.shape_cast %57 : vector<1xf32> to vector<1x1x1xf32>
    %59 = vector.extract %58[0, 0, 0] : f32 from vector<1x1x1xf32>
    %c0_27 = arith.constant 0 : index
    %c0_28 = arith.constant 0 : index
    %60 = memref.load %arg1[%c0_27, %c0_28] : memref<1x1xf32, #tpu.memory_space<smem>>
    memref.store %59, %arg1[%c0_27, %c0_28] : memref<1x1xf32, #tpu.memory_space<smem>>
    return
  }
}

</mosaic_0001>

<bundles_post_ra>
// kernel: custom_loss.1
= control target key start
LH: loop header
LB: loop body
LE: loop exit
PB: predicated region body
PF: predicated region fallthrough
CT: control target
= control target key end

     0   :  { %vm40_vm0 = vcmask 132096   ;;  %v111_v4 = vmov 0.0   ;;  %s149_s0 = inlined_call_operand.vmem [shape: f32[6,2,17], index: 0, kind: input, shape index: {}]   ;;  %s150_s1 = inlined_call_operand.hbm [shape: f32[1,1], index: 1, kind: output, shape index: {}]  }
   0x1   :  { %v86_v0 = vld [vmem:[%s149_s0 + $0xa] sm:$0x3]  ;;  %v85_v1 = vld [vmem:[%s149_s0 + $0x8] sm:$0x3]  ;;  %v26_v2 = vld [vmem:[%s149_s0] sm:$0x3] }
   0x2   :  { %vm47_vm1 = vcmp.eq.f32.partialorder %v86_v0, 1.0  ;;  %vm25_vm2 = vcmp.ge.f32.partialorder %v85_v1, 0.5  ;;  %v87_v3 = vld [vmem:[%s149_s0 + $0x4] sm:$0x3]  ;;  %95 = vlog2.f32 %v85_v1  ;;  %v88_v7 = vld [vmem:[%s149_s0 + $0x2] sm:$0x3] }
   0x3   :  { %v90_v5 = vsel %vm47_vm1, 1.0, %v111_v4  ;;  %v29_v6 = vsub.f32 %v26_v2, %v87_v3  ;;  %v89_v8 = vld [vmem:[%s149_s0 + $0x6] sm:$0x3]  ;;  %v16_v9 = vsub.f32 1.0, %v85_v1 }
   0x4   :  { %v50_v10 = vsel %vm40_vm0, %v90_v5, 0.0  ;;  %v35_v11 = vsub.f32 %v88_v7, %v89_v8 }
   0x5   :  { %6 = vsyncpa [#allocation3], 0  ;;  %51 = vadd.xlane.f32.xlu0 %v50_v10  ;;  %v30_v12 = vsel %vm25_vm2, %v29_v6, 0.0  ;;  %97 = vlog2.f32 %v16_v9  ;;  %v21_v23 = vsub.f32 1.0, %v86_v0  ;;  %vm59_vm3 = vcmask 1024   ;;  %s112_s18 = smov [#allocation2]  }
   0x6   :  { %v36_v13 = vsel %vm25_vm2, %v35_v11, 0.0  ;;  %v37_v14 = vmul.f32 %v30_v12, %v30_v12 }
   0x7   :  { %v38_v15 = vmul.f32 %v36_v13, %v36_v13 }
   0x9   :  { %v39_v16 = vadd.f32 %v38_v15, %v37_v14 }
   0xb   :  { %v44_v17 = vsel %vm40_vm0, %v39_v16, 0.0 }
   0xc   :  { %45 = vadd.xlane.f32.xlu0 %v44_v17 }
   0xf   :  { %v96_v18 = vpop.eup %95 }
  0x10   :  { %v14_v19 = vmul.f32 0.6931472, %v96_v18 }
  0x12   :  { %v98_v20 = vpop.eup %97  ;;  %v15_v21 = vmax.f32 %v14_v19, -100.0 }
  0x13   :  { %v18_v22 = vmul.f32 0.6931472, %v98_v20 }
  0x14   :  { %v20_v25 = vmul.f32 %v86_v0, %v15_v21 }
  0x15   :  { %v19_v24 = vmax.f32 %v18_v22, -100.0 }
  0x17   :  { %v22_v26 = vmul.f32 %v21_v23, %v19_v24 }
  0x19   :  { %v23_v27 = vadd.f32 %v22_v26, %v20_v25 }
  0x1b   :  { %v24_v28 = vsub.f32 0.0, %v23_v27 }
  0x1d   :  { %v41_v29 = vsel %vm40_vm0, %v24_v28, 0.0 }
  0x1e   :  { %42 = vadd.xlane.f32.xlu1 %v41_v29 }
  0x8e   :  { %v52_v30 = vpop.xlane.xlu0 %51 }
  0x8f   :  { %v53_v31 = vadd.f32 1.0, %v52_v30 }
  0x91   :  { %99 = vrcp.f32 %v53_v31 }
  0x95   :  { %v46_v32 = vpop.xlane.xlu0 %45 }
  0x96   :  { %v55_v33 = vmul.f32 0.25, %v46_v32 }
  0x9e   :  { %v100_v34 = vpop.eup %99 }
  0x9f   :  { %v57_v35 = vmul.f32 %v100_v34, %v55_v33 }
  0xa7   :  { %v43_v36 = vpop.xlane.xlu1 %42 }
  0xa8   :  { %v54_v37 = vmul.f32 0.029411765, %v43_v36 }
  0xaa   :  { %v58_v38 = vadd.f32 %v57_v35, %v54_v37 }
  0xac   :  { %v60_v39 = vsel %vm59_vm3, %v58_v38, 0.0 }
  0xad   :  { %61 = vadd.xlane.f32.xlu1 %v60_v39 }
 0x136   :  { %v62_v40 = vpop.xlane.xlu1 %61 }
 0x137   :  { %v63_v41 = vrot.slane %v62_v40, 4 }
 0x139   :  { %v64_v42 = vadd.f32 %v63_v41, %v62_v40 }
 0x13b   :  { %v65_v43 = vrot.slane %v64_v42, 2 }
 0x13d   :  { %v66_v44 = vadd.f32 %v65_v43, %v64_v42 }
 0x13f   :  { %v67_v45 = vrot.slane %v66_v44, 1 }
 0x141   :  { %v68_v46 = vadd.f32 %v67_v45, %v66_v44 }
 0x143   :  { %91 = vpush %v68_v46 }
 0x174   :  { %s92_s0 = spop %91 }
 0x175   :  { %71 = sst [smem:[#allocation2]] %s92_s0 }
 0x176   :  { %79 = dma.smem_to_hbm %s112_s18, 16, %s150_s1, [#allocation3]  }
 0x177   :  { %109 = dma.done.wait [#allocation3], 16  }
 0x178   :  { %110 = vsyncadd [#allocation3], 4294967280 }
 0x179   :  { %83 = sfence }
 0x17a   :  { %84 = vsyncpa [#allocation3], 1 }

</bundles_post_ra>
